<compile_context>
chip_gen: v5e
topology: v5e:2x2
jax: 0.10.0
libtpu: 0.0.40
codegen_flags: <defaults>
</compile_context>

<pallas_src>
import functools

import jax
import jax.numpy as jnp
from jax import lax
from jax.experimental import pallas as pl
from jax.experimental.pallas import tpu as pltpu

LANE = 128


# -----------------------------------------------------------------------------
# Tiling / compiler-parameter helpers
# -----------------------------------------------------------------------------
def _round_up(x, m):
    return ((x + m - 1) // m) * m


@functools.lru_cache(maxsize=None)
def _vmem_limit_bytes():
    # ~3/4 of the per-core physical VMEM (96 MiB on v5e/v6e, 48 MiB on v7x);
    # conservative fallback if the query is unavailable.
    try:
        cap = int(pltpu.get_tpu_info().vmem_capacity_bytes)
    except Exception:
        cap = 64 * 1024 * 1024
    return max(32 * 1024 * 1024, (3 * cap) // 4)


def _compiler_params():
    return pltpu.CompilerParams(
        dimension_semantics=("parallel", "parallel", "arbitrary"),
        vmem_limit_bytes=_vmem_limit_bytes(),
    )


def _pick_tm(m):
    # Large row tiles for the HBM roofline, but keep several grid steps when M
    # allows (pipelining overlap + megacore sharding of the parallel M axis).
    if m >= 8 * 512:
        return 512
    if m >= 8 * 256:
        return 256
    if m >= 128:
        return 128
    return _round_up(max(m, 8), 8)


def _tiles(m, k, c):
    tm = _pick_tm(m)
    m_pad = _round_up(m, tm)
    c_pad = _round_up(c, LANE)          # lane-dense output channels
    tc = min(c_pad, 256)                # 256-wide tiles fill the v6e/v7x MXU
    if k <= 1024:
        tk, k_pad = k, k                # single K step, weight tile resident
    else:
        tk = 512                        # K-axis reduction tiling for big shapes
        k_pad = _round_up(k, tk)
    grid = (m_pad // tm, c_pad // tc, k_pad // tk)
    return tm, m_pad, tc, c_pad, tk, k_pad, grid


def _pad2(a, rows, cols):
    r, c = a.shape
    if r == rows and c == cols:
        return a
    return jnp.pad(a, ((0, rows - r), (0, cols - c)))


# -----------------------------------------------------------------------------
# Pallas kernels (bf16 MXU operands, f32 accumulator, fused BN/residual/ReLU)
# -----------------------------------------------------------------------------
def _conv_bn_kernel(p_ref, w_ref, b_ref, o_ref, acc_ref, *, relu):
    @pl.when(pl.program_id(2) == 0)
    def _init():
        acc_ref[...] = jnp.zeros_like(acc_ref)

    acc_ref[...] += jnp.dot(p_ref[...], w_ref[...],
                            preferred_element_type=jnp.float32)

    @pl.when(pl.program_id(2) == pl.num_programs(2) - 1)
    def _epilogue():
        out = acc_ref[...] + b_ref[...]          # BN scale already folded into w
        if relu:
            out = jnp.maximum(out, 0.0)
        o_ref[...] = out.astype(o_ref.dtype)


def _conv_bn_proj_add_relu_kernel(p_ref, w_ref, b_ref, xs_ref, ws_ref, bs_ref,
                                  o_ref, acc_ref):
    @pl.when(pl.program_id(2) == 0)
    def _init():
        acc_ref[...] = jnp.zeros_like(acc_ref)

    acc_ref[...] += jnp.dot(p_ref[...], w_ref[...],
                            preferred_element_type=jnp.float32)

    @pl.when(pl.program_id(2) == pl.num_programs(2) - 1)
    def _epilogue():
        shortcut = jnp.dot(xs_ref[...], ws_ref[...],
                           preferred_element_type=jnp.float32) + bs_ref[...]
        out = acc_ref[...] + b_ref[...] + shortcut
        o_ref[...] = jnp.maximum(out, 0.0).astype(o_ref.dtype)


def _conv_bn_res_add_relu_kernel(p_ref, w_ref, b_ref, r_ref, o_ref, acc_ref):
    @pl.when(pl.program_id(2) == 0)
    def _init():
        acc_ref[...] = jnp.zeros_like(acc_ref)

    acc_ref[...] += jnp.dot(p_ref[...], w_ref[...],
                            preferred_element_type=jnp.float32)

    @pl.when(pl.program_id(2) == pl.num_programs(2) - 1)
    def _epilogue():
        out = acc_ref[...] + b_ref[...] + r_ref[...].astype(jnp.float32)
        o_ref[...] = jnp.maximum(out, 0.0).astype(o_ref.dtype)


# -----------------------------------------------------------------------------
# pallas_call wrappers
# -----------------------------------------------------------------------------
def fused_conv_bn(patches, w_folded, bias, *, relu, out_dtype=jnp.float32):
    """out[:M, :C] = [relu]((patches @ w_folded) + bias)."""
    M, K = patches.shape
    C = w_folded.shape[1]
    tm, m_pad, tc, c_pad, tk, k_pad, grid = _tiles(M, K, C)

    p = _pad2(patches, m_pad, k_pad).astype(jnp.bfloat16)
    w = _pad2(w_folded, k_pad, c_pad).astype(jnp.bfloat16)
    b = _pad2(bias.reshape(1, -1), 1, c_pad).astype(jnp.float32)

    out = pl.pallas_call(
        functools.partial(_conv_bn_kernel, relu=relu),
        out_shape=jax.ShapeDtypeStruct((m_pad, c_pad), out_dtype),
        grid=grid,
        in_specs=[
            pl.BlockSpec((tm, tk), lambda i, j, k: (i, k)),
            pl.BlockSpec((tk, tc), lambda i, j, k: (k, j)),
            pl.BlockSpec((1, tc), lambda i, j, k: (0, j)),
        ],
        out_specs=pl.BlockSpec((tm, tc), lambda i, j, k: (i, j)),
        scratch_shapes=[pltpu.VMEM((tm, tc), jnp.float32)],
        compiler_params=_compiler_params(),
    )(p, w, b)
    return out[:M, :C]


def fused_conv_bn_proj_add_relu(patches, w_folded, bias, xs, ws_folded, bias_s):
    """out = relu(patches @ w + bias + xs @ ws + bias_s)  (projection shortcut fused)."""
    M, K = patches.shape
    C = w_folded.shape[1]
    ks = xs.shape[1]
    ks_pad = _round_up(ks, LANE)
    tm, m_pad, tc, c_pad, tk, k_pad, grid = _tiles(M, K, C)

    p = _pad2(patches, m_pad, k_pad).astype(jnp.bfloat16)
    w = _pad2(w_folded, k_pad, c_pad).astype(jnp.bfloat16)
    b = _pad2(bias.reshape(1, -1), 1, c_pad).astype(jnp.float32)
    xsp = _pad2(xs, m_pad, ks_pad).astype(jnp.bfloat16)
    wsp = _pad2(ws_folded, ks_pad, c_pad).astype(jnp.bfloat16)
    bsp = _pad2(bias_s.reshape(1, -1), 1, c_pad).astype(jnp.float32)

    out = pl.pallas_call(
        _conv_bn_proj_add_relu_kernel,
        out_shape=jax.ShapeDtypeStruct((m_pad, c_pad), jnp.float32),
        grid=grid,
        in_specs=[
            pl.BlockSpec((tm, tk), lambda i, j, k: (i, k)),
            pl.BlockSpec((tk, tc), lambda i, j, k: (k, j)),
            pl.BlockSpec((1, tc), lambda i, j, k: (0, j)),
            pl.BlockSpec((tm, ks_pad), lambda i, j, k: (i, 0)),
            pl.BlockSpec((ks_pad, tc), lambda i, j, k: (0, j)),
            pl.BlockSpec((1, tc), lambda i, j, k: (0, j)),
        ],
        out_specs=pl.BlockSpec((tm, tc), lambda i, j, k: (i, j)),
        scratch_shapes=[pltpu.VMEM((tm, tc), jnp.float32)],
        compiler_params=_compiler_params(),
    )(p, w, b, xsp, wsp, bsp)
    return out[:M, :C]


def fused_conv_bn_res_add_relu(patches, w_folded, bias, residual):
    """out = relu(patches @ w + bias + residual)  (identity shortcut fused)."""
    M, K = patches.shape
    C = w_folded.shape[1]
    tm, m_pad, tc, c_pad, tk, k_pad, grid = _tiles(M, K, C)

    p = _pad2(patches, m_pad, k_pad).astype(jnp.bfloat16)
    w = _pad2(w_folded, k_pad, c_pad).astype(jnp.bfloat16)
    b = _pad2(bias.reshape(1, -1), 1, c_pad).astype(jnp.float32)
    r = _pad2(residual, m_pad, c_pad).astype(jnp.float32)

    out = pl.pallas_call(
        _conv_bn_res_add_relu_kernel,
        out_shape=jax.ShapeDtypeStruct((m_pad, c_pad), jnp.float32),
        grid=grid,
        in_specs=[
            pl.BlockSpec((tm, tk), lambda i, j, k: (i, k)),
            pl.BlockSpec((tk, tc), lambda i, j, k: (k, j)),
            pl.BlockSpec((1, tc), lambda i, j, k: (0, j)),
            pl.BlockSpec((tm, tc), lambda i, j, k: (i, j)),
        ],
        out_specs=pl.BlockSpec((tm, tc), lambda i, j, k: (i, j)),
        scratch_shapes=[pltpu.VMEM((tm, tc), jnp.float32)],
        compiler_params=_compiler_params(),
    )(p, w, b, r)
    return out[:M, :C]


# -----------------------------------------------------------------------------
# Plain-JAX glue: im2col, BN folding, weight reshaping
# -----------------------------------------------------------------------------
def im2col(x_nhwc, ksize, stride, pad):
    """Returns patches (N*Ho*Wo, ksize*ksize*C) and (N, Ho, Wo)."""
    N, H, W, C = x_nhwc.shape
    xp = jnp.pad(x_nhwc, ((0, 0), (pad, pad), (pad, pad), (0, 0)))
    Ho = (H + 2 * pad - ksize) // stride + 1
    Wo = (W + 2 * pad - ksize) // stride + 1
    cols = []
    for kh in range(ksize):
        for kw in range(ksize):
            cols.append(
                xp[:, kh:kh + Ho * stride:stride, kw:kw + Wo * stride:stride, :])
    patches = jnp.concatenate(cols, axis=-1)            # (N, Ho, Wo, k*k*C)
    return patches.reshape(N * Ho * Wo, ksize * ksize * C), (N, Ho, Wo)


def reshape_conv_weight(w_oihw):
    """(Cout, Cin, kh, kw) -> (kh*kw*Cin, Cout), matching im2col column order."""
    cout, cin, kh, kw = w_oihw.shape
    return jnp.transpose(w_oihw, (2, 3, 1, 0)).reshape(kh * kw * cin, cout)


def fold_bn(bn, eps=1e-5):
    scale = bn["gamma"] / jnp.sqrt(bn["var"] + eps)
    bias = bn["beta"] - bn["mean"] * scale
    return scale, bias


def fold_conv_bn_weights(w_oihw, bn):
    """Eval-mode BN folded into the conv: w' = w * scale (per out channel), + bias."""
    scale, bias = fold_bn(bn)
    w = reshape_conv_weight(w_oihw) * scale[None, :]
    return w, bias


# -----------------------------------------------------------------------------
# BasicBlock forward
# -----------------------------------------------------------------------------
@functools.partial(jax.jit, static_argnames=("stride",))
def basic_block_forward(x_nchw, params, stride):
    x = jnp.transpose(x_nchw, (0, 2, 3, 1))             # NCHW -> NHWC (f32)
    x_bf16 = x.astype(jnp.bfloat16)                     # bf16 MXU operands
    N, H, W, cin = x.shape
    planes = params["w1"].shape[0]

    # conv1 (3x3, stride, pad=1) + bn1 + relu  ->  bf16 intermediate
    p1, (N, Ho, Wo) = im2col(x_bf16, 3, stride, 1)
    w1, b1 = fold_conv_bn_weights(params["w1"], params["bn1"])
    out1 = fused_conv_bn(p1, w1, b1, relu=True, out_dtype=jnp.bfloat16)
    out1_nhwc = out1.reshape(N, Ho, Wo, planes)

    # conv2 (3x3, stride=1, pad=1) + bn2 + shortcut + relu, fused in one kernel
    p2, _ = im2col(out1_nhwc, 3, 1, 1)
    w2, b2 = fold_conv_bn_weights(params["w2"], params["bn2"])

    if stride != 1 or cin != planes:
        # projection shortcut (1x1 conv + BN) computed inside the same grid step
        xs = x_bf16[:, ::stride, ::stride, :].reshape(N * Ho * Wo, cin)
        ws, bs = fold_conv_bn_weights(params["ws"], params["bns"])
        out = fused_conv_bn_proj_add_relu(p2, w2, b2, xs, ws, bs)
    else:
        res = x.reshape(N * H * W, cin)                 # identity shortcut (f32 add)
        out = fused_conv_bn_res_add_relu(p2, w2, b2, res)

    return jnp.transpose(out.reshape(N, Ho, Wo, planes), (0, 3, 1, 2))


# -----------------------------------------------------------------------------
# Pure-JAX reference (eval-mode BN), for correctness checking
# -----------------------------------------------------------------------------
def reference_forward(x, params, stride, eps=1e-5):
    hp = lax.Precision.HIGHEST

    def conv(inp, w, s, pad):
        return lax.conv_general_dilated(
            inp, w, window_strides=(s, s), padding=((pad, pad), (pad, pad)),
            dimension_numbers=("NCHW", "OIHW", "NCHW"), precision=hp)

    def bn(inp, p):
        scale = p["gamma"] / jnp.sqrt(p["var"] + eps)
        bias = p["beta"] - p["mean"] * scale
        return inp * scale[None, :, None, None] + bias[None, :, None, None]

    out = jax.nn.relu(bn(conv(x, params["w1"], stride, 1), params["bn1"]))
    out = bn(conv(out, params["w2"], 1, 1), params["bn2"])
    if "ws" in params:
        sc = bn(conv(x, params["ws"], stride, 0), params["bns"])
    else:
        sc = x
    return jax.nn.relu(out + sc)


# -----------------------------------------------------------------------------
# Deterministic parameter construction (shapes follow the PyTorch __init__)
# -----------------------------------------------------------------------------
def make_bn_params(c, offset):
    return {
        "gamma": 1.0 + 0.1 * jnp.arange(c, dtype=jnp.float32),
        "beta": 0.05 * jnp.arange(c, dtype=jnp.float32) + offset,
        "mean": 0.01 * jnp.arange(c, dtype=jnp.float32),
        "var": 1.0 + 0.02 * jnp.arange(c, dtype=jnp.float32),
    }


def make_params(key, in_planes, planes, stride):
    k1, k2, k3 = jax.random.split(key, 3)
    params = {
        "w1": 0.1 * jax.random.normal(k1, (planes, in_planes, 3, 3), jnp.float32),
        "bn1": make_bn_params(planes, 0.0),
        "w2": 0.1 * jax.random.normal(k2, (planes, planes, 3, 3), jnp.float32),
        "bn2": make_bn_params(planes, 0.01),
    }
    if stride != 1 or in_planes != planes:
        params["ws"] = 0.1 * jax.random.normal(k3, (planes, in_planes, 1, 1), jnp.float32)
        params["bns"] = make_bn_params(planes, 0.02)
    return params


if __name__ == "__main__":
    key = jax.random.PRNGKey(0)

    # Config 1: projection shortcut (stride 2, channel change).
    in_planes, planes, stride = 8, 16, 2
    N, H, W = 2, 16, 16
    kx, kp, key = jax.random.split(key, 3)
    x = jax.random.normal(kx, (N, in_planes, H, W), jnp.float32)
    params = make_params(kp, in_planes, planes, stride)

    out = jax.block_until_ready(basic_block_forward(x, params, stride))
    ref = reference_forward(x, params, stride)
    assert out.shape == (N, planes, H // stride, W // stride), out.shape
    assert bool(jnp.all(jnp.isfinite(out)))
    assert bool(jnp.all(out >= 0.0))                     # final ReLU
    err = float(jnp.max(jnp.abs(out - ref)))
    tol = 2e-2 * float(jnp.max(jnp.abs(ref))) + 1e-1     # bf16-operand tolerance
    assert err < tol, (err, tol)

    # Config 2: identity shortcut (stride 1, same channels).
    in_planes2 = planes2 = 16
    N2, H2, W2 = 2, 8, 8
    kx2, kp2 = jax.random.split(key)
    x2 = jax.random.normal(kx2, (N2, in_planes2, H2, W2), jnp.float32)
    params2 = make_params(kp2, in_planes2, planes2, 1)

    out2 = jax.block_until_ready(basic_block_forward(x2, params2, 1))
    ref2 = reference_forward(x2, params2, 1)
    assert out2.shape == (N2, planes2, H2, W2), out2.shape
    assert bool(jnp.all(out2 >= 0.0))
    err2 = float(jnp.max(jnp.abs(out2 - ref2)))
    tol2 = 2e-2 * float(jnp.max(jnp.abs(ref2))) + 1e-1
    assert err2 < tol2, (err2, tol2)

    print("KERNEL_OK")
</pallas_src>

<mosaic_0001>
module attributes {stable_mosaic.version = 11 : i64} {
  func.func @_conv_bn_kernel(%arg0: i32, %arg1: i32, %arg2: i32, %arg3: memref<128x72xbf16, #tpu.memory_space<vmem>>, %arg4: memref<72x128xbf16, #tpu.memory_space<vmem>>, %arg5: memref<1x128xf32, #tpu.memory_space<vmem>>, %arg6: memref<128x128xbf16, #tpu.memory_space<vmem>>, %arg7: memref<128x128xf32, #tpu.memory_space<vmem>>) attributes {dimension_semantics = [#tpu.dimension_semantics<parallel>, #tpu.dimension_semantics<parallel>, #tpu.dimension_semantics<arbitrary>], iteration_bounds = array<i64: 1, 1, 1>, scalar_prefetch = 0 : i64, scratch_operands = 1 : i64, tpu.core_type = #tpu.core_type<tc>, window_params = [{transform_indices = @transform_0, window_bounds = array<i64: 128, 72>}, {transform_indices = @transform_1, window_bounds = array<i64: 72, 128>}, {transform_indices = @transform_2, window_bounds = array<i64: 1, 128>}, {transform_indices = @transform_3, window_bounds = array<i64: 128, 128>}]} {
    %c0_i32 = arith.constant 0 : i32
    %0 = arith.cmpi eq, %arg2, %c0_i32 : i32
    %1 = arith.extui %0 : i1 to i32
    %c0_i32_0 = arith.constant 0 : i32
    %2 = arith.cmpi ne, %1, %c0_i32_0 : i32
    scf.if %2 {
      %cst_10 = arith.constant 0.000000e+00 : f32
      %12 = vector.broadcast %cst_10 : f32 to vector<128x128xf32>
      %c0_11 = arith.constant 0 : index
      %c0_12 = arith.constant 0 : index
      %13 = vector.load %arg7[%c0_11, %c0_12] : memref<128x128xf32, #tpu.memory_space<vmem>>, vector<128x128xf32>
      tpu.vector_store %arg7[%c0_11, %c0_12], %12 {strides = array<i32>} : memref<128x128xf32, #tpu.memory_space<vmem>>, vector<128x128xf32>,
    } else {
    }
    %c0 = arith.constant 0 : index
    %c0_1 = arith.constant 0 : index
    %3 = vector.load %arg7[%c0, %c0_1] : memref<128x128xf32, #tpu.memory_space<vmem>>, vector<128x128xf32>
    %c0_2 = arith.constant 0 : index
    %c0_3 = arith.constant 0 : index
    %4 = vector.load %arg3[%c0_2, %c0_3] : memref<128x72xbf16, #tpu.memory_space<vmem>>, vector<128x72xbf16>
    %c0_4 = arith.constant 0 : index
    %c0_5 = arith.constant 0 : index
    %5 = vector.load %arg4[%c0_4, %c0_5] : memref<72x128xbf16, #tpu.memory_space<vmem>>, vector<72x128xbf16>
    %cst = arith.constant dense<0.000000e+00> : vector<128x128xf32>
    %6 = tpu.matmul %4, %5, %cst {dimension_numbers = #tpu.dot_dimension_numbers<[1], [0], [0], [1], [0, 0, 1, 1], [], []>} : vector<128x72xbf16>, vector<72x128xbf16>, vector<128x128xf32> -> vector<128x128xf32>
    %7 = arith.addf %3, %6 : vector<128x128xf32>
    %c0_6 = arith.constant 0 : index
    %c0_7 = arith.constant 0 : index
    %8 = vector.load %arg7[%c0_6, %c0_7] : memref<128x128xf32, #tpu.memory_space<vmem>>, vector<128x128xf32>
    tpu.vector_store %arg7[%c0_6, %c0_7], %7 {strides = array<i32>} : memref<128x128xf32, #tpu.memory_space<vmem>>, vector<128x128xf32>,
    %c0_i32_8 = arith.constant 0 : i32
    %9 = arith.cmpi eq, %arg2, %c0_i32_8 : i32
    %10 = arith.extui %9 : i1 to i32
    %c0_i32_9 = arith.constant 0 : i32
    %11 = arith.cmpi ne, %10, %c0_i32_9 : i32
    scf.if %11 {
      %c0_10 = arith.constant 0 : index
      %c0_11 = arith.constant 0 : index
      %12 = vector.load %arg7[%c0_10, %c0_11] : memref<128x128xf32, #tpu.memory_space<vmem>>, vector<128x128xf32>
      %c0_12 = arith.constant 0 : index
      %c0_13 = arith.constant 0 : index
      %13 = vector.load %arg5[%c0_12, %c0_13] : memref<1x128xf32, #tpu.memory_space<vmem>>, vector<1x128xf32>
      %14 = vector.broadcast %13 : vector<1x128xf32> to vector<128x128xf32>
      %15 = arith.addf %12, %14 : vector<128x128xf32>
      %cst_14 = arith.constant 0.000000e+00 : f32
      %16 = vector.broadcast %cst_14 : f32 to vector<128x128xf32>
      %17 = arith.maximumf %15, %16 : vector<128x128xf32>
      %18 = arith.truncf %17 : vector<128x128xf32> to vector<128x128xbf16>
      %c0_15 = arith.constant 0 : index
      %c0_16 = arith.constant 0 : index
      %19 = vector.load %arg6[%c0_15, %c0_16] : memref<128x128xbf16, #tpu.memory_space<vmem>>, vector<128x128xbf16>
      tpu.vector_store %arg6[%c0_15, %c0_16], %18 {strides = array<i32>} : memref<128x128xbf16, #tpu.memory_space<vmem>>, vector<128x128xbf16>,
    } else {
    }
    return
  }
  func.func @transform_0(%arg0: i32, %arg1: i32, %arg2: i32) -> (i32, i32) {
    %c0_i32 = arith.constant 0 : i32
    return %arg0, %arg2 : i32, i32
  }
  func.func @transform_1(%arg0: i32, %arg1: i32, %arg2: i32) -> (i32, i32) {
    %c0_i32 = arith.constant 0 : i32
    return %arg2, %arg1 : i32, i32
  }
  func.func @transform_2(%arg0: i32, %arg1: i32, %arg2: i32) -> (i32, i32) {
    %c0_i32 = arith.constant 0 : i32
    %c0_i32_0 = arith.constant 0 : i32
    return %c0_i32, %arg1 : i32, i32
  }
  func.func @transform_3(%arg0: i32, %arg1: i32, %arg2: i32) -> (i32, i32) {
    %c0_i32 = arith.constant 0 : i32
    return %arg0, %arg1 : i32, i32
  }
}

module attributes {stable_mosaic.version = 11 : i64} {
  func.func @_conv_bn_proj_add_relu_kernel(%arg0: i32, %arg1: i32, %arg2: i32, %arg3: memref<128x144xbf16, #tpu.memory_space<vmem>>, %arg4: memref<144x128xbf16, #tpu.memory_space<vmem>>, %arg5: memref<1x128xf32, #tpu.memory_space<vmem>>, %arg6: memref<128x128xbf16, #tpu.memory_space<vmem>>, %arg7: memref<128x128xbf16, #tpu.memory_space<vmem>>, %arg8: memref<1x128xf32, #tpu.memory_space<vmem>>, %arg9: memref<128x128xf32, #tpu.memory_space<vmem>>, %arg10: memref<128x128xf32, #tpu.memory_space<vmem>>) attributes {dimension_semantics = [#tpu.dimension_semantics<parallel>, #tpu.dimension_semantics<parallel>, #tpu.dimension_semantics<arbitrary>], iteration_bounds = array<i64: 1, 1, 1>, scalar_prefetch = 0 : i64, scratch_operands = 1 : i64, tpu.core_type = #tpu.core_type<tc>, window_params = [{transform_indices = @transform_0, window_bounds = array<i64: 128, 144>}, {transform_indices = @transform_1, window_bounds = array<i64: 144, 128>}, {transform_indices = @transform_2, window_bounds = array<i64: 1, 128>}, {transform_indices = @transform_3, window_bounds = array<i64: 128, 128>}, {transform_indices = @transform_4, window_bounds = array<i64: 128, 128>}, {transform_indices = @transform_5, window_bounds = array<i64: 1, 128>}, {transform_indices = @transform_6, window_bounds = array<i64: 128, 128>}]} {
    %c0_i32 = arith.constant 0 : i32
    %0 = arith.cmpi eq, %arg2, %c0_i32 : i32
    %1 = arith.extui %0 : i1 to i32
    %c0_i32_0 = arith.constant 0 : i32
    %2 = arith.cmpi ne, %1, %c0_i32_0 : i32
    scf.if %2 {
      %cst_10 = arith.constant 0.000000e+00 : f32
      %12 = vector.broadcast %cst_10 : f32 to vector<128x128xf32>
      %c0_11 = arith.constant 0 : index
      %c0_12 = arith.constant 0 : index
      %13 = vector.load %arg10[%c0_11, %c0_12] : memref<128x128xf32, #tpu.memory_space<vmem>>, vector<128x128xf32>
      tpu.vector_store %arg10[%c0_11, %c0_12], %12 {strides = array<i32>} : memref<128x128xf32, #tpu.memory_space<vmem>>, vector<128x128xf32>,
    } else {
    }
    %c0 = arith.constant 0 : index
    %c0_1 = arith.constant 0 : index
    %3 = vector.load %arg10[%c0, %c0_1] : memref<128x128xf32, #tpu.memory_space<vmem>>, vector<128x128xf32>
    %c0_2 = arith.constant 0 : index
    %c0_3 = arith.constant 0 : index
    %4 = vector.load %arg3[%c0_2, %c0_3] : memref<128x144xbf16, #tpu.memory_space<vmem>>, vector<128x144xbf16>
    %c0_4 = arith.constant 0 : index
    %c0_5 = arith.constant 0 : index
    %5 = vector.load %arg4[%c0_4, %c0_5] : memref<144x128xbf16, #tpu.memory_space<vmem>>, vector<144x128xbf16>
    %cst = arith.constant dense<0.000000e+00> : vector<128x128xf32>
    %6 = tpu.matmul %4, %5, %cst {dimension_numbers = #tpu.dot_dimension_numbers<[1], [0], [0], [1], [0, 0, 1, 1], [], []>} : vector<128x144xbf16>, vector<144x128xbf16>, vector<128x128xf32> -> vector<128x128xf32>
    %7 = arith.addf %3, %6 : vector<128x128xf32>
    %c0_6 = arith.constant 0 : index
    %c0_7 = arith.constant 0 : index
    %8 = vector.load %arg10[%c0_6, %c0_7] : memref<128x128xf32, #tpu.memory_space<vmem>>, vector<128x128xf32>
    tpu.vector_store %arg10[%c0_6, %c0_7], %7 {strides = array<i32>} : memref<128x128xf32, #tpu.memory_space<vmem>>, vector<128x128xf32>,
    %c0_i32_8 = arith.constant 0 : i32
    %9 = arith.cmpi eq, %arg2, %c0_i32_8 : i32
    %10 = arith.extui %9 : i1 to i32
    %c0_i32_9 = arith.constant 0 : i32
    %11 = arith.cmpi ne, %10, %c0_i32_9 : i32
    scf.if %11 {
      %c0_10 = arith.constant 0 : index
      %c0_11 = arith.constant 0 : index
      %12 = vector.load %arg6[%c0_10, %c0_11] : memref<128x128xbf16, #tpu.memory_space<vmem>>, vector<128x128xbf16>
      %c0_12 = arith.constant 0 : index
      %c0_13 = arith.constant 0 : index
      %13 = vector.load %arg7[%c0_12, %c0_13] : memref<128x128xbf16, #tpu.memory_space<vmem>>, vector<128x128xbf16>
      %cst_14 = arith.constant dense<0.000000e+00> : vector<128x128xf32>
      %14 = tpu.matmul %12, %13, %cst_14 {dimension_numbers = #tpu.dot_dimension_numbers<[1], [0], [0], [1], [0, 0, 1, 1], [], []>} : vector<128x128xbf16>, vector<128x128xbf16>, vector<128x128xf32> -> vector<128x128xf32>
      %c0_15 = arith.constant 0 : index
      %c0_16 = arith.constant 0 : index
      %15 = vector.load %arg8[%c0_15, %c0_16] : memref<1x128xf32, #tpu.memory_space<vmem>>, vector<1x128xf32>
      %16 = vector.broadcast %15 : vector<1x128xf32> to vector<128x128xf32>
      %17 = arith.addf %14, %16 : vector<128x128xf32>
      %c0_17 = arith.constant 0 : index
      %c0_18 = arith.constant 0 : index
      %18 = vector.load %arg10[%c0_17, %c0_18] : memref<128x128xf32, #tpu.memory_space<vmem>>, vector<128x128xf32>
      %c0_19 = arith.constant 0 : index
      %c0_20 = arith.constant 0 : index
      %19 = vector.load %arg5[%c0_19, %c0_20] : memref<1x128xf32, #tpu.memory_space<vmem>>, vector<1x128xf32>
      %20 = vector.broadcast %19 : vector<1x128xf32> to vector<128x128xf32>
      %21 = arith.addf %18, %20 : vector<128x128xf32>
      %22 = arith.addf %21, %17 : vector<128x128xf32>
      %cst_21 = arith.constant 0.000000e+00 : f32
      %23 = vector.broadcast %cst_21 : f32 to vector<128x128xf32>
      %24 = arith.maximumf %22, %23 : vector<128x128xf32>
      %c0_22 = arith.constant 0 : index
      %c0_23 = arith.constant 0 : index
      %25 = vector.load %arg9[%c0_22, %c0_23] : memref<128x128xf32, #tpu.memory_space<vmem>>, vector<128x128xf32>
      tpu.vector_store %arg9[%c0_22, %c0_23], %24 {strides = array<i32>} : memref<128x128xf32, #tpu.memory_space<vmem>>, vector<128x128xf32>,
    } else {
    }
    return
  }
  func.func @transform_0(%arg0: i32, %arg1: i32, %arg2: i32) -> (i32, i32) {
    %c0_i32 = arith.constant 0 : i32
    return %arg0, %arg2 : i32, i32
  }
  func.func @transform_1(%arg0: i32, %arg1: i32, %arg2: i32) -> (i32, i32) {
    %c0_i32 = arith.constant 0 : i32
    return %arg2, %arg1 : i32, i32
  }
  func.func @transform_2(%arg0: i32, %arg1: i32, %arg2: i32) -> (i32, i32) {
    %c0_i32 = arith.constant 0 : i32
    %c0_i32_0 = arith.constant 0 : i32
    return %c0_i32, %arg1 : i32, i32
  }
  func.func @transform_3(%arg0: i32, %arg1: i32, %arg2: i32) -> (i32, i32) {
    %c0_i32 = arith.constant 0 : i32
    %c0_i32_0 = arith.constant 0 : i32
    return %arg0, %c0_i32 : i32, i32
  }
  func.func @transform_4(%arg0: i32, %arg1: i32, %arg2: i32) -> (i32, i32) {
    %c0_i32 = arith.constant 0 : i32
    %c0_i32_0 = arith.constant 0 : i32
    return %c0_i32, %arg1 : i32, i32
  }
  func.func @transform_5(%arg0: i32, %arg1: i32, %arg2: i32) -> (i32, i32) {
    %c0_i32 = arith.constant 0 : i32
    %c0_i32_0 = arith.constant 0 : i32
    return %c0_i32, %arg1 : i32, i32
  }
  func.func @transform_6(%arg0: i32, %arg1: i32, %arg2: i32) -> (i32, i32) {
    %c0_i32 = arith.constant 0 : i32
    return %arg0, %arg1 : i32, i32
  }
}

</mosaic_0001>

<bundles_post_ra>
// kernel: basic_block_forward.2
= control target key start
LH: loop header
LB: loop body
LE: loop exit
PB: predicated region body
PF: predicated region fallthrough
CT: control target
= control target key end

     0   :  { %vm168_vm0 = vcmask 1043456   ;;  %vm143_vm1 = vcmask 588800   ;;  %s569_s1 = inlined_call_operand.vmem [shape: bf16[72,128], index: 1, kind: input, shape index: {}]   ;;  %s570_s2 = inlined_call_operand.vmem [shape: f32[1,128], index: 2, kind: input, shape index: {}]   ;;  %s571_s0 = inlined_call_operand.vmem [shape: bf16[128,72], index: 0, kind: input, shape index: {}]   ;;  %s572_s3 = inlined_call_operand.vmem [shape: bf16[128,128], index: 3, kind: output, shape index: {}]  }
   0x1   :  { %v75_v0 = vld [vmem:[%s569_s1 + $0x20] sm:$0xf]  ;;  %v411_v4 = vld [vmem:[%s569_s1 + $0x18] sm:$0xff]  ;;  %v410_v5 = vld [vmem:[%s569_s1 + $0x10] sm:$0xff] }
   0x2   :  { %v133_v1 = vunpack.c.l.b16 %v75_v0  ;;  %v409_v6 = vld [vmem:[%s569_s1 + $0x8] sm:$0xff]  ;;  %v408_v7 = vld [vmem:[%s569_s1] sm:$0xff]  ;;  %v402_v9 = vld [vmem:[%s571_s0 + $0x10] sm:$0xff] }
   0x3   :  { %v400_v8 = vld [vmem:[%s571_s0] sm:$0xff]  ;;  %v406_v11 = vld [vmem:[%s571_s0 + $0x30] sm:$0xff]  ;;  %v401_v12 = vld [vmem:[%s571_s0 + $0x8] sm:$0xff] }
   0x4   :  { %v138_v2 = vpack.c.b16 %v133_v1, %v133_v1  ;;  %v404_v10 = vld [vmem:[%s571_s0 + $0x20] sm:$0xff]  ;;  %v403_v13 = vld [vmem:[%s571_s0 + $0x18] sm:$0xff]  ;;  %v405_v14 = vld [vmem:[%s571_s0 + $0x28] sm:$0xff] }
   0x5   :  { %v407_v15 = vld [vmem:[%s571_s0 + $0x38] sm:$0xff]  ;;  %v474_v18 = vld [vmem:[%s570_s2] ss:$0 sm:$0xff] }
   0x6   :  { %v170_v3 = vsel %vm168_vm0, %v138_v2, 0 }
   0x7   :  { %175 = vmatpush.bf16.msra.mxu0 %v170_v3  ;;  %459 = vmatpush.bf16.msra.mxu1 %v170_v3 }
   0x8   :  { %460 = vmatpush.bf16.msra.mxu2 %v170_v3  ;;  %461 = vmatpush.bf16.msra.mxu3 %v170_v3 }
   0xb   :  { %176 = vmatpush.bf16.msra.mxu0 %v411_v4  ;;  %462 = vmatpush.bf16.msra.mxu1 %v411_v4 }
   0xc   :  { %463 = vmatpush.bf16.msra.mxu2 %v411_v4  ;;  %464 = vmatpush.bf16.msra.mxu3 %v411_v4 }
   0xf   :  { %177 = vmatpush.bf16.msra.mxu0 %v410_v5  ;;  %465 = vmatpush.bf16.msra.mxu1 %v410_v5 }
  0x10   :  { %466 = vmatpush.bf16.msra.mxu2 %v410_v5  ;;  %467 = vmatpush.bf16.msra.mxu3 %v410_v5 }
  0x13   :  { %178 = vmatpush.bf16.msra.mxu0 %v409_v6  ;;  %468 = vmatpush.bf16.msra.mxu1 %v409_v6 }
  0x14   :  { %469 = vmatpush.bf16.msra.mxu2 %v409_v6  ;;  %470 = vmatpush.bf16.msra.mxu3 %v409_v6 }
  0x17   :  { %179 = vmatpush.bf16.msra.mxu0 %v408_v7  ;;  %471 = vmatpush.bf16.msra.mxu1 %v408_v7 }
  0x18   :  { %472 = vmatpush.bf16.msra.mxu2 %v408_v7  ;;  %473 = vmatpush.bf16.msra.mxu3 %v408_v7 }
  0x1a   :  { %392 = vmatmul.msk.bf16.vlgmr.msra.gmra.mxu0 %vm143_vm1, %v400_v8  ;;  %394 = vmatmul.msk.bf16.vlgmr.msra.gmra.mxu1 %vm143_vm1, %v402_v9 }
  0x1b   :  { %396 = vmatmul.msk.bf16.vlgmr.msra.gmra.mxu2 %vm143_vm1, %v404_v10  ;;  %398 = vmatmul.msk.bf16.vlgmr.msra.gmra.mxu3 %vm143_vm1, %v406_v11 }
  0x2a   :  { %393 = vmatmul.msk.bf16.gmra.mxu0 %vm143_vm1, %v401_v12  ;;  %395 = vmatmul.msk.bf16.gmra.mxu1 %vm143_vm1, %v403_v13 }
  0x2b   :  { %397 = vmatmul.msk.bf16.gmra.mxu2 %vm143_vm1, %v405_v14  ;;  %399 = vmatmul.msk.bf16.gmra.mxu3 %vm143_vm1, %v407_v15 }
  0x97   :  { %v181_v16 = vpop.f32.mrf.mxu0  ;;  %v191_v17 = vpop.f32.mrf.mxu1 }
  0x98   :  { %v276_v19 = vadd.f32 %v474_v18, %v181_v16  ;;  %v280_v20 = vadd.f32 %v474_v18, %v191_v17 }
  0x9a   :  { %v292_v27 = vmax.f32 %v276_v19, 0.0  ;;  %v296_v28 = vmax.f32 %v280_v20, 0.0 }
  0x9e   :  { %v201_v21 = vpop.f32.mrf.mxu2  ;;  %v211_v22 = vpop.f32.mrf.mxu3 }
  0x9f   :  { %v183_v23 = vpop.f32.mrf.mxu0  ;;  %v193_v24 = vpop.f32.mrf.mxu1  ;;  %v284_v33 = vadd.f32 %v474_v18, %v201_v21  ;;  %v288_v34 = vadd.f32 %v474_v18, %v211_v22 }
  0xa0   :  { %v277_v25 = vadd.f32 %v474_v18, %v183_v23  ;;  %v281_v26 = vadd.f32 %v474_v18, %v193_v24 }
  0xa1   :  { %v300_v41 = vmax.f32 %v284_v33, 0.0  ;;  %v304_v42 = vmax.f32 %v288_v34, 0.0 }
  0xa2   :  { %v293_v29 = vmax.f32 %v277_v25, 0.0  ;;  %v297_v30 = vmax.f32 %v281_v26, 0.0 }
  0xa4   :  { %v415_v31 = vpack.c.bf16 %v293_v29, %v292_v27  ;;  %v425_v32 = vpack.c.bf16 %v297_v30, %v296_v28 }
  0xa6   :  { %416 = vst [vmem:[%s572_s3] sm:$0xff] %v415_v31   ;;  %v203_v35 = vpop.f32.mrf.mxu2  ;;  %v213_v36 = vpop.f32.mrf.mxu3 }
  0xa7   :  { %453 = vst [vmem:[%s572_s3 + $0x10] sm:$0xff] %v425_v32   ;;  %v285_v37 = vadd.f32 %v474_v18, %v203_v35  ;;  %v289_v38 = vadd.f32 %v474_v18, %v213_v36  ;;  %v186_v39 = vpop.f32.mrf.mxu0  ;;  %v196_v40 = vpop.f32.mrf.mxu1 }
  0xa8   :  { %v278_v47 = vadd.f32 %v474_v18, %v186_v39  ;;  %v282_v48 = vadd.f32 %v474_v18, %v196_v40 }
  0xa9   :  { %v301_v43 = vmax.f32 %v285_v37, 0.0  ;;  %v305_v44 = vmax.f32 %v289_v38, 0.0 }
  0xaa   :  { %v294_v55 = vmax.f32 %v278_v47, 0.0  ;;  %v298_v56 = vmax.f32 %v282_v48, 0.0 }
  0xab   :  { %v435_v45 = vpack.c.bf16 %v301_v43, %v300_v41  ;;  %v445_v46 = vpack.c.bf16 %v305_v44, %v304_v42 }
  0xad   :  { %455 = vst [vmem:[%s572_s3 + $0x20] sm:$0xff] %v435_v45  }
  0xae   :  { %457 = vst [vmem:[%s572_s3 + $0x30] sm:$0xff] %v445_v46   ;;  %v206_v49 = vpop.f32.mrf.mxu2  ;;  %v216_v50 = vpop.f32.mrf.mxu3 }
  0xaf   :  { %v188_v51 = vpop.f32.mrf.mxu0  ;;  %v198_v52 = vpop.f32.mrf.mxu1  ;;  %v286_v61 = vadd.f32 %v474_v18, %v206_v49  ;;  %v290_v62 = vadd.f32 %v474_v18, %v216_v50 }
  0xb0   :  { %v279_v53 = vadd.f32 %v474_v18, %v188_v51  ;;  %v283_v54 = vadd.f32 %v474_v18, %v198_v52 }
  0xb1   :  { %v302_v3 = vmax.f32 %v286_v61, 0.0  ;;  %v306_v4 = vmax.f32 %v290_v62, 0.0 }
  0xb2   :  { %v295_v57 = vmax.f32 %v279_v53, 0.0  ;;  %v299_v58 = vmax.f32 %v283_v54, 0.0 }
  0xb4   :  { %v420_v59 = vpack.c.bf16 %v295_v57, %v294_v55  ;;  %v430_v60 = vpack.c.bf16 %v299_v58, %v298_v56 }
  0xb6   :  { %452 = vst [vmem:[%s572_s3 + $0x8] sm:$0xff] %v420_v59   ;;  %v208_v63 = vpop.f32.mrf.mxu2  ;;  %v218_v0 = vpop.f32.mrf.mxu3 }
  0xb7   :  { %454 = vst [vmem:[%s572_s3 + $0x18] sm:$0xff] %v430_v60   ;;  %v287_v1 = vadd.f32 %v474_v18, %v208_v63  ;;  %v291_v2 = vadd.f32 %v474_v18, %v218_v0 }
  0xb9   :  { %v303_v5 = vmax.f32 %v287_v1, 0.0  ;;  %v307_v6 = vmax.f32 %v291_v2, 0.0 }
  0xbb   :  { %v440_v7 = vpack.c.bf16 %v303_v5, %v302_v3  ;;  %v450_v8 = vpack.c.bf16 %v307_v6, %v306_v4 }
  0xbd   :  { %456 = vst [vmem:[%s572_s3 + $0x28] sm:$0xff] %v440_v7  }
  0xbe   :  { %458 = vst [vmem:[%s572_s3 + $0x38] sm:$0xff] %v450_v8  }

// kernel: basic_block_forward.3
= control target key start
LH: loop header
LB: loop body
LE: loop exit
PB: predicated region body
PF: predicated region fallthrough
CT: control target
= control target key end

     0   :  { %vm221_vm0 = vcmask 130048   ;;  %s1190_s0 = inlined_call_operand.vmem [shape: bf16[128,144], index: 0, kind: input, shape index: {}]   ;;  %s1191_s1 = inlined_call_operand.vmem [shape: bf16[144,128], index: 1, kind: input, shape index: {}]   ;;  %s1192_s2 = inlined_call_operand.vmem [shape: f32[1,128], index: 2, kind: input, shape index: {}]   ;;  %s1193_s3 = inlined_call_operand.vmem [shape: bf16[128,128], index: 3, kind: input, shape index: {}]   ;;  %s1194_s4 = inlined_call_operand.vmem [shape: bf16[128,128], index: 4, kind: input, shape index: {}]   ;;  %s1195_s5 = inlined_call_operand.vmem [shape: f32[1,128], index: 5, kind: input, shape index: {}]   ;;  %s1196_s6 = inlined_call_operand.hbm [shape: f32[128,128], index: 6, kind: output, shape index: {}]  }
   0x1   :  { %v857_v0 = vld [vmem:[%s1191_s1 + $0x38] sm:$0xff]  ;;  %v858_v1 = vld [vmem:[%s1191_s1 + $0x40] sm:$0xff]  ;;  %v666_v4 = vld [vmem:[%s1190_s0 + $0x8] sm:$0xf0] }
   0x2   :  { %v874_v2 = vld [vmem:[%s1194_s4 + $0x38] sm:$0xff]  ;;  %v834_v3 = vld [vmem:[%s1190_s0 + $0x4] sm:$0xf]  ;;  %246 = vmatpush.bf16.msra.mxu0 %v857_v0  ;;  %302 = vmatpush.bf16.msra.mxu1 %v858_v1  ;;  %v856_v6 = vld [vmem:[%s1191_s1 + $0x30] sm:$0xff] }
   0x3   :  { %v669_v5 = vor.u32 %v834_v3, %v666_v4  ;;  %511 = vmatpush.bf16.msra.mxu2 %v874_v2  ;;  %v873_v7 = vld [vmem:[%s1194_s4 + $0x30] sm:$0xff]  ;;  %875 = vmatpush.bf16.msra.mxu3 %v857_v0  ;;  %v855_v8 = vld [vmem:[%s1191_s1 + $0x28] sm:$0xff]  ;;  %v854_v10 = vld [vmem:[%s1191_s1 + $0x20] sm:$0xff] }
   0x4   :  { %v872_v9 = vld [vmem:[%s1194_s4 + $0x28] sm:$0xff] }
   0x5   :  { %762 = vmatmul.msk.bf16.vlgmr.msra.gmra.mxu1 %vm221_vm0, %v669_v5 }
   0x6   :  { %247 = vmatpush.bf16.msra.mxu0 %v856_v6 }
   0x7   :  { %512 = vmatpush.bf16.msra.mxu2 %v873_v7  ;;  %876 = vmatpush.bf16.msra.mxu3 %v856_v6 }
   0xa   :  { %248 = vmatpush.bf16.msra.mxu0 %v855_v8 }
   0xb   :  { %11 = vsyncpa [#allocation4], 0  ;;  %513 = vmatpush.bf16.msra.mxu2 %v872_v9  ;;  %v871_v11 = vld [vmem:[%s1194_s4 + $0x20] sm:$0xff]  ;;  %877 = vmatpush.bf16.msra.mxu3 %v855_v8  ;;  %v853_v12 = vld [vmem:[%s1191_s1 + $0x18] sm:$0xff]  ;;  %s650_s13 = sshll.u32 %s1196_s6, 4  ;;  %s923_s14 = smov 128   ;;  %s651_s13 = int_to_ptr.hbm [resolvable:$true] %s650_s13 }
   0xc   :  { %v836_v13 = vld [vmem:[%s1190_s0 + $0x14] sm:$0xf]  ;;  %v674_v14 = vld [vmem:[%s1190_s0 + $0x18] sm:$0xf0]  ;;  %v851_v19 = vld [vmem:[%s1191_s1 + $0x8] sm:$0xff]  ;;  %s924_s15 = smov 8  }
   0xd   :  { %v870_v15 = vld [vmem:[%s1194_s4 + $0x18] sm:$0xff]  ;;  %v677_v16 = vor.u32 %v836_v13, %v674_v14  ;;  %v852_v17 = vld [vmem:[%s1191_s1 + $0x10] sm:$0xff]  ;;  %v868_v20 = vld [vmem:[%s1194_s4 + $0x8] sm:$0xff] }
   0xe   :  { %249 = vmatpush.bf16.msra.mxu0 %v854_v10  ;;  %v869_v18 = vld [vmem:[%s1194_s4 + $0x10] sm:$0xff]  ;;  %v850_v21 = vld [vmem:[%s1191_s1] sm:$0xff]  ;;  %v835_v23 = vld [vmem:[%s1190_s0 + $0x4] sm:$0xf0] }
   0xf   :  { %514 = vmatpush.bf16.msra.mxu2 %v871_v11  ;;  %878 = vmatpush.bf16.msra.mxu3 %v854_v10  ;;  %v664_v22 = vld [vmem:[%s1190_s0] sm:$0xf]  ;;  %v847_v26 = vld [vmem:[%s1190_s0 + $0x64] sm:$0xf0]  ;;  %v838_v29 = vld [vmem:[%s1190_s0 + $0x24] sm:$0xf] }
  0x10   :  { %v867_v24 = vld [vmem:[%s1194_s4] sm:$0xff]  ;;  %v665_v27 = vor.u32 %v835_v23, %v664_v22  ;;  %v682_v30 = vld [vmem:[%s1190_s0 + $0x28] sm:$0xf0]  ;;  %v672_v33 = vld [vmem:[%s1190_s0 + $0x10] sm:$0xf] }
  0x11   :  { %v712_v25 = vld [vmem:[%s1190_s0 + $0x60] sm:$0xf]  ;;  %v685_v32 = vor.u32 %v838_v29, %v682_v30  ;;  %v837_v34 = vld [vmem:[%s1190_s0 + $0x14] sm:$0xf0]  ;;  %v720_v35 = vld [vmem:[%s1190_s0 + $0x70] sm:$0xf] }
  0x12   :  { %250 = vmatpush.bf16.msra.mxu0 %v853_v12  ;;  %v859_v28 = vld [vmem:[%s1193_s3] sm:$0xff]  ;;  %v713_v31 = vor.u32 %v847_v26, %v712_v25  ;;  %v849_v36 = vld [vmem:[%s1190_s0 + $0x74] sm:$0xf0]  ;;  %v673_v37 = vor.u32 %v837_v34, %v672_v33  ;;  %v860_v38 = vld [vmem:[%s1193_s3 + $0x8] sm:$0xff] }
  0x13   :  { %515 = vmatpush.bf16.msra.mxu2 %v870_v15  ;;  %879 = vmatpush.bf16.msra.mxu3 %v853_v12  ;;  %v840_v39 = vld [vmem:[%s1190_s0 + $0x34] sm:$0xf]  ;;  %v690_v40 = vld [vmem:[%s1190_s0 + $0x38] sm:$0xf0]  ;;  %v721_v41 = vor.u32 %v849_v36, %v720_v35  ;;  %v680_v43 = vld [vmem:[%s1190_s0 + $0x20] sm:$0xf] }
  0x14   :  { %v693_v42 = vor.u32 %v840_v39, %v690_v40  ;;  %v839_v44 = vld [vmem:[%s1190_s0 + $0x24] sm:$0xf0]  ;;  %v861_v46 = vld [vmem:[%s1193_s3 + $0x10] sm:$0xff]  ;;  %v842_v47 = vld [vmem:[%s1190_s0 + $0x44] sm:$0xf] }
  0x15   :  { %763 = vmatmul.msk.bf16.gmra.mxu1 %vm221_vm0, %v677_v16  ;;  %v681_v45 = vor.u32 %v839_v44, %v680_v43  ;;  %v698_v48 = vld [vmem:[%s1190_s0 + $0x48] sm:$0xf0]  ;;  %v865_v49 = vld [vmem:[%s1193_s3 + $0x30] sm:$0xff]  ;;  %v841_v52 = vld [vmem:[%s1190_s0 + $0x34] sm:$0xf0] }
  0x16   :  { %251 = vmatpush.bf16.msra.mxu0 %v852_v17  ;;  %v701_v50 = vor.u32 %v842_v47, %v698_v48  ;;  %v688_v51 = vld [vmem:[%s1190_s0 + $0x30] sm:$0xf]  ;;  %v862_v54 = vld [vmem:[%s1193_s3 + $0x18] sm:$0xff]  ;;  %v844_v55 = vld [vmem:[%s1190_s0 + $0x54] sm:$0xf] }
  0x17   :  { %516 = vmatpush.bf16.msra.mxu2 %v869_v18  ;;  %880 = vmatpush.bf16.msra.mxu3 %v852_v17  ;;  %v689_v53 = vor.u32 %v841_v52, %v688_v51  ;;  %v706_v56 = vld [vmem:[%s1190_s0 + $0x58] sm:$0xf0]  ;;  %v696_v59 = vld [vmem:[%s1190_s0 + $0x40] sm:$0xf]  ;;  %v843_v60 = vld [vmem:[%s1190_s0 + $0x44] sm:$0xf0] }
  0x18   :  { %v866_v57 = vld [vmem:[%s1193_s3 + $0x38] sm:$0xff]  ;;  %v709_v58 = vor.u32 %v844_v55, %v706_v56  ;;  %v697_v61 = vor.u32 %v843_v60, %v696_v59  ;;  %v863_v62 = vld [vmem:[%s1193_s3 + $0x20] sm:$0xff]  ;;  %v714_v0 = vld [vmem:[%s1190_s0 + $0x68] sm:$0xf0] }
  0x19   :  { %v846_v63 = vld [vmem:[%s1190_s0 + $0x64] sm:$0xf]  ;;  %v845_v3 = vld [vmem:[%s1190_s0 + $0x54] sm:$0xf0]  ;;  %v864_v5 = vld [vmem:[%s1193_s3 + $0x28] sm:$0xff] }
  0x1a   :  { %252 = vmatpush.bf16.msra.mxu0 %v851_v19  ;;  %v717_v1 = vor.u32 %v846_v63, %v714_v0  ;;  %v848_v6 = vld [vmem:[%s1190_s0 + $0x74] sm:$0xf]  ;;  %v1147_v17 = vld [vmem:[%s1195_s5] ss:$0 sm:$0xff] }
  0x1b   :  { %517 = vmatpush.bf16.msra.mxu2 %v868_v20  ;;  %881 = vmatpush.bf16.msra.mxu3 %v851_v19 }
  0x1e   :  { %253 = vmatpush.bf16.msra.mxu0 %v850_v21 }
  0x1f   :  { %518 = vmatpush.bf16.msra.mxu2 %v867_v24  ;;  %882 = vmatpush.bf16.msra.mxu3 %v850_v21 }
  0x21   :  { %254 = vmatmul.bf16.vlgmr.msra.gmra.mxu0 %v665_v27 }
  0x22   :  { %519 = vmatmul.bf16.vlgmr.msra.gmra.mxu2 %v859_v28  ;;  %284 = vmatmul.bf16.vlgmr.msra.gmra.mxu3 %v713_v31 }
  0x23   :  { %883 = vmatpush.bf16.msrb.mxu3 %v874_v2  ;;  %v704_v2 = vld [vmem:[%s1190_s0 + $0x50] sm:$0xf] }
  0x24   :  { %v705_v4 = vor.u32 %v845_v3, %v704_v2 }
  0x25   :  { %764 = vmatmul.msk.bf16.gmra.mxu1 %vm221_vm0, %v685_v32 }
  0x27   :  { %884 = vmatpush.bf16.msrb.mxu3 %v873_v7  ;;  %v722_v7 = vld [vmem:[%s1190_s0 + $0x78] sm:$0xf0]  ;;  %s922_s0 = smov [#allocation3]  }
  0x28   :  { %v725_v8 = vor.u32 %v848_v6, %v722_v7 }
  0x2b   :  { %885 = vmatpush.bf16.msrb.mxu3 %v872_v9 }
  0x2f   :  { %886 = vmatpush.bf16.msrb.mxu3 %v871_v11 }
  0x31   :  { %259 = vmatmul.bf16.gmra.mxu0 %v673_v37 }
  0x32   :  { %524 = vmatmul.bf16.gmra.mxu2 %v860_v38  ;;  %289 = vmatmul.bf16.gmra.mxu3 %v721_v41 }
  0x33   :  { %887 = vmatpush.bf16.msrb.mxu3 %v870_v15  ;;  %v1142_v15 = vld [vmem:[%s1192_s2] ss:$0 sm:$0xff]  ;;  %s648_s2 = sshll.u32 %s922_s0, 4  ;;  %s649_s2 = int_to_ptr.vmem [resolvable:$true] %s648_s2 }
  0x35   :  { %765 = vmatmul.msk.bf16.gmra.mxu1 %vm221_vm0, %v693_v42 }
  0x37   :  { %888 = vmatpush.bf16.msrb.mxu3 %v869_v18 }
  0x3b   :  { %889 = vmatpush.bf16.msrb.mxu3 %v868_v20 }
  0x3f   :  { %890 = vmatpush.bf16.msrb.mxu3 %v867_v24 }
  0x41   :  { %264 = vmatmul.bf16.gmra.mxu0 %v681_v45 }
  0x42   :  { %529 = vmatmul.bf16.gmra.mxu2 %v861_v46  ;;  %549 = vmatmul.bf16.vlgmr.msrb.gmra.mxu3 %v865_v49 }
  0x45   :  { %766 = vmatmul.msk.bf16.gmra.mxu1 %vm221_vm0, %v701_v50 }
  0x51   :  { %269 = vmatmul.bf16.gmra.mxu0 %v689_v53 }
  0x52   :  { %534 = vmatmul.bf16.gmra.mxu2 %v862_v54  ;;  %554 = vmatmul.bf16.gmra.mxu3 %v866_v57 }
  0x55   :  { %767 = vmatmul.msk.bf16.gmra.mxu1 %vm221_vm0, %v709_v58 }
  0x61   :  { %274 = vmatmul.bf16.gmra.mxu0 %v697_v61 }
  0x62   :  { %539 = vmatmul.bf16.gmra.mxu2 %v863_v62 }
  0x65   :  { %768 = vmatmul.msk.bf16.gmra.mxu1 %vm221_vm0, %v717_v1 }
  0x71   :  { %279 = vmatmul.bf16.gmra.mxu0 %v705_v4 }
  0x72   :  { %544 = vmatmul.bf16.gmra.mxu2 %v864_v5 }
  0x75   :  { %769 = vmatmul.msk.bf16.gmra.mxu1 %vm221_vm0, %v725_v8 }
  0x82   :  { %v304_v9 = vpop.f32.mrf.mxu1 }
  0x8a   :  { %v306_v10 = vpop.f32.mrf.mxu1 }
  0x92   :  { %v309_v11 = vpop.f32.mrf.mxu1 }
  0x9a   :  { %v311_v12 = vpop.f32.mrf.mxu1 }
  0x9e   :  { %v255_v13 = vpop.f32.mrf.mxu0 }
  0x9f   :  { %v305_v14 = vadd.f32 %v304_v9, %v255_v13 }
  0xa1   :  { %v580_v19 = vadd.f32 %v1142_v15, %v305_v14 }
  0xa2   :  { %v314_v16 = vpop.f32.mrf.mxu1 }
  0xa5   :  { %v520_v18 = vpop.f32.mrf.mxu2  ;;  %v285_v34 = vpop.f32.mrf.mxu3 }
  0xa6   :  { %v521_v20 = vadd.f32 %v1147_v17, %v520_v18  ;;  %v257_v21 = vpop.f32.mrf.mxu0 }
  0xa7   :  { %v307_v24 = vadd.f32 %v306_v10, %v257_v21 }
  0xa8   :  { %v596_v22 = vadd.f32 %v580_v19, %v521_v20 }
  0xa9   :  { %v581_v27 = vadd.f32 %v1142_v15, %v307_v24 }
  0xaa   :  { %v612_v23 = vmax.f32 %v596_v22, 0.0  ;;  %v316_v25 = vpop.f32.mrf.mxu1 }
  0xac   :  { %628 = vst [vmem:[#allocation3] sm:$0xff] %v612_v23 }
  0xad   :  { %v522_v26 = vpop.f32.mrf.mxu2  ;;  %v287_v47 = vpop.f32.mrf.mxu3 }
  0xae   :  { %v523_v28 = vadd.f32 %v1147_v17, %v522_v26  ;;  %v260_v29 = vpop.f32.mrf.mxu0 }
  0xaf   :  { %v310_v32 = vadd.f32 %v309_v11, %v260_v29 }
  0xb0   :  { %v597_v30 = vadd.f32 %v581_v27, %v523_v28 }
  0xb1   :  { %v582_v36 = vadd.f32 %v1142_v15, %v310_v32 }
  0xb2   :  { %v613_v31 = vmax.f32 %v597_v30, 0.0  ;;  %v319_v33 = vpop.f32.mrf.mxu1 }
  0xb4   :  { %629 = vst [vmem:[#allocation3 + $0x8] sm:$0xff] %v613_v31 }
  0xb5   :  { %v525_v35 = vpop.f32.mrf.mxu2  ;;  %v1159_v57 = vpop.f32.mrf.mxu3 }
  0xb6   :  { %v526_v37 = vadd.f32 %v1147_v17, %v525_v35  ;;  %v262_v38 = vpop.f32.mrf.mxu0 }
  0xb7   :  { %v312_v41 = vadd.f32 %v311_v12, %v262_v38 }
  0xb8   :  { %v598_v39 = vadd.f32 %v582_v36, %v526_v37 }
  0xb9   :  { %v583_v44 = vadd.f32 %v1142_v15, %v312_v41 }
  0xba   :  { %v614_v40 = vmax.f32 %v598_v39, 0.0  ;;  %v321_v42 = vpop.f32.mrf.mxu1 }
  0xbc   :  { %630 = vst [vmem:[#allocation3 + $0x10] sm:$0xff] %v614_v40 }
  0xbd   :  { %v527_v43 = vpop.f32.mrf.mxu2  ;;  %v1163_v5 = vpop.f32.mrf.mxu3 }
  0xbe   :  { %v528_v45 = vadd.f32 %v1147_v17, %v527_v43  ;;  %v265_v46 = vpop.f32.mrf.mxu0 }
  0xbf   :  { %v315_v50 = vadd.f32 %v314_v16, %v265_v46 }
  0xc0   :  { %v599_v48 = vadd.f32 %v583_v44, %v528_v45 }
  0xc1   :  { %v584_v53 = vadd.f32 %v1142_v15, %v315_v50 }
  0xc2   :  { %v615_v49 = vmax.f32 %v599_v48, 0.0  ;;  %v324_v51 = vpop.f32.mrf.mxu1 }
  0xc4   :  { %631 = vst [vmem:[#allocation3 + $0x18] sm:$0xff] %v615_v49 }
  0xc5   :  { %v530_v52 = vpop.f32.mrf.mxu2  ;;  %v550_v14 = vpop.f32.mrf.mxu3 }
  0xc6   :  { %v531_v54 = vadd.f32 %v1147_v17, %v530_v52  ;;  %v267_v55 = vpop.f32.mrf.mxu0 }
  0xc7   :  { %v317_v59 = vadd.f32 %v316_v25, %v267_v55  ;;  %v551_v25 = vadd.f32 %v1147_v17, %v550_v14 }
  0xc8   :  { %v600_v56 = vadd.f32 %v584_v53, %v531_v54 }
  0xc9   :  { %v585_v62 = vadd.f32 %v1142_v15, %v317_v59 }
  0xca   :  { %v616_v58 = vmax.f32 %v600_v56, 0.0  ;;  %v326_v60 = vpop.f32.mrf.mxu1 }
  0xcc   :  { %632 = vst [vmem:[#allocation3 + $0x20] sm:$0xff] %v616_v58 }
  0xcd   :  { %v532_v61 = vpop.f32.mrf.mxu2  ;;  %v552_v31 = vpop.f32.mrf.mxu3 }
  0xce   :  { %v533_v63 = vadd.f32 %v1147_v17, %v532_v61  ;;  %v270_v0 = vpop.f32.mrf.mxu0 }
  0xcf   :  { %v320_v3 = vadd.f32 %v319_v33, %v270_v0 }
  0xd0   :  { %v601_v1 = vadd.f32 %v585_v62, %v533_v63 }
  0xd1   :  { %v586_v7 = vadd.f32 %v1142_v15, %v320_v3 }
  0xd2   :  { %v617_v2 = vmax.f32 %v601_v1, 0.0  ;;  %v329_v4 = vpop.f32.mrf.mxu1 }
  0xd4   :  { %633 = vst [vmem:[#allocation3 + $0x28] sm:$0xff] %v617_v2 }
  0xd5   :  { %v535_v6 = vpop.f32.mrf.mxu2  ;;  %v555_v49 = vpop.f32.mrf.mxu3 }
  0xd6   :  { %v536_v8 = vadd.f32 %v1147_v17, %v535_v6  ;;  %v272_v9 = vpop.f32.mrf.mxu0 }
  0xd7   :  { %v322_v12 = vadd.f32 %v321_v42, %v272_v9 }
  0xd8   :  { %v602_v10 = vadd.f32 %v586_v7, %v536_v8 }
  0xd9   :  { %v587_v18 = vadd.f32 %v1142_v15, %v322_v12 }
  0xda   :  { %v618_v11 = vmax.f32 %v602_v10, 0.0  ;;  %v331_v13 = vpop.f32.mrf.mxu1 }
  0xdc   :  { %634 = vst [vmem:[#allocation3 + $0x30] sm:$0xff] %v618_v11 }
  0xdd   :  { %v537_v16 = vpop.f32.mrf.mxu2  ;;  %v557_v1 = vpop.f32.mrf.mxu3 }
  0xde   :  { %v538_v19 = vadd.f32 %v1147_v17, %v537_v16  ;;  %v275_v20 = vpop.f32.mrf.mxu0 }
  0xdf   :  { %v325_v23 = vadd.f32 %v324_v51, %v275_v20 }
  0xe0   :  { %v603_v21 = vadd.f32 %v587_v18, %v538_v19 }
  0xe1   :  { %v588_v29 = vadd.f32 %v1142_v15, %v325_v23 }
  0xe2   :  { %v619_v22 = vmax.f32 %v603_v21, 0.0  ;;  %v334_v24 = vpop.f32.mrf.mxu1 }
  0xe3   :  { %v335_v26 = vadd.f32 %v334_v24, %v285_v34  ;;  %v553_v34 = vadd.f32 %v1147_v17, %v552_v31 }
  0xe4   :  { %635 = vst [vmem:[#allocation3 + $0x38] sm:$0xff] %v619_v22 }
  0xe5   :  { %v592_v27 = vadd.f32 %v1142_v15, %v335_v26  ;;  %v540_v28 = vpop.f32.mrf.mxu2 }
  0xe6   :  { %v541_v30 = vadd.f32 %v1147_v17, %v540_v28  ;;  %v277_v32 = vpop.f32.mrf.mxu0 }
  0xe7   :  { %v608_v33 = vadd.f32 %v592_v27, %v551_v25  ;;  %v327_v38 = vadd.f32 %v326_v60, %v277_v32 }
  0xe8   :  { %v604_v35 = vadd.f32 %v588_v29, %v541_v30 }
  0xe9   :  { %v624_v36 = vmax.f32 %v608_v33, 0.0  ;;  %v589_v43 = vadd.f32 %v1142_v15, %v327_v38 }
  0xea   :  { %v620_v37 = vmax.f32 %v604_v35, 0.0  ;;  %v336_v39 = vpop.f32.mrf.mxu1 }
  0xeb   :  { %640 = vst [vmem:[#allocation3 + $0x60] sm:$0xff] %v624_v36  ;;  %v337_v40 = vadd.f32 %v336_v39, %v287_v47  ;;  %v556_v47 = vadd.f32 %v1147_v17, %v555_v49 }
  0xec   :  { %636 = vst [vmem:[#allocation3 + $0x40] sm:$0xff] %v620_v37 }
  0xed   :  { %v593_v41 = vadd.f32 %v1142_v15, %v337_v40  ;;  %v542_v42 = vpop.f32.mrf.mxu2 }
  0xee   :  { %v543_v44 = vadd.f32 %v1147_v17, %v542_v42  ;;  %v280_v45 = vpop.f32.mrf.mxu0 }
  0xef   :  { %v609_v46 = vadd.f32 %v593_v41, %v553_v34  ;;  %v330_v52 = vadd.f32 %v329_v4, %v280_v45 }
  0xf0   :  { %v605_v48 = vadd.f32 %v589_v43, %v543_v44 }
  0xf1   :  { %v625_v50 = vmax.f32 %v609_v46, 0.0  ;;  %v590_v58 = vadd.f32 %v1142_v15, %v330_v52 }
  0xf2   :  { %v621_v51 = vmax.f32 %v605_v48, 0.0  ;;  %v339_v53 = vpop.f32.mrf.mxu1 }
  0xf3   :  { %641 = vst [vmem:[#allocation3 + $0x68] sm:$0xff] %v625_v50  ;;  %v340_v54 = vadd.f32 %v339_v53, %v1159_v57  ;;  %v558_v57 = vadd.f32 %v1147_v17, %v557_v1 }
  0xf4   :  { %637 = vst [vmem:[#allocation3 + $0x48] sm:$0xff] %v621_v51 }
  0xf5   :  { %v594_v55 = vadd.f32 %v1142_v15, %v340_v54  ;;  %v545_v56 = vpop.f32.mrf.mxu2 }
  0xf6   :  { %v546_v59 = vadd.f32 %v1147_v17, %v545_v56  ;;  %v282_v61 = vpop.f32.mrf.mxu0 }
  0xf7   :  { %v610_v60 = vadd.f32 %v594_v55, %v556_v47  ;;  %v332_v2 = vadd.f32 %v331_v13, %v282_v61 }
  0xf8   :  { %v606_v62 = vadd.f32 %v590_v58, %v546_v59 }
  0xf9   :  { %v626_v63 = vmax.f32 %v610_v60, 0.0  ;;  %v591_v8 = vadd.f32 %v1142_v15, %v332_v2 }
  0xfa   :  { %v622_v0 = vmax.f32 %v606_v62, 0.0  ;;  %v341_v3 = vpop.f32.mrf.mxu1 }
  0xfb   :  { %642 = vst [vmem:[#allocation3 + $0x70] sm:$0xff] %v626_v63  ;;  %v342_v4 = vadd.f32 %v341_v3, %v1163_v5 }
  0xfc   :  { %638 = vst [vmem:[#allocation3 + $0x50] sm:$0xff] %v622_v0 }
  0xfd   :  { %v595_v6 = vadd.f32 %v1142_v15, %v342_v4  ;;  %v547_v7 = vpop.f32.mrf.mxu2 }
  0xfe   :  { %v548_v9 = vadd.f32 %v1147_v17, %v547_v7 }
  0xff   :  { %v611_v10 = vadd.f32 %v595_v6, %v558_v57 }
 0x100   :  { %v607_v11 = vadd.f32 %v591_v8, %v548_v9 }
 0x101   :  { %v627_v12 = vmax.f32 %v611_v10, 0.0 }
 0x102   :  { %v623_v5 = vmax.f32 %v607_v11, 0.0 }
 0x103   :  { %643 = vst [vmem:[#allocation3 + $0x78] sm:$0xff] %v627_v12 }
 0x104   :  { %639 = vst [vmem:[#allocation3 + $0x58] sm:$0xff] %v623_v5 }
 0x105   :  { %656 = dma.vmem_to_hbm [thread:$0]  %s649_s2, 2048, %s651_s13, [#allocation4], %s923_s14, %s923_s14, %s924_s15  }
 0x106   :  { %920 = dma.done.wait [#allocation4], 2048  }
 0x107   :  { %921 = vsyncadd [#allocation4], 4294965248 }
 0x108   :  { %661 = vsyncpa [#allocation4], 1 }

</bundles_post_ra>
